<compile_context>
chip_gen: v5e
topology: v5e:2x2
jax: 0.10.0
libtpu: 0.0.40
codegen_flags: <defaults>
</compile_context>

<pallas_src>
import functools

import jax
import jax.numpy as jnp
from jax.experimental import pallas as pl
from jax.experimental.pallas import tpu as pltpu


def _cdiv(a, b):
    return -(-a // b)


def _round_up(x, m):
    return _cdiv(x, m) * m


def _dft_matrices(n_fft):
    # Periodic Hann window (torch.hann_window default) folded into the real-DFT
    # matrices along with torchaudio's normalized=True scaling 1/sqrt(sum(w^2)).
    n = jnp.arange(n_fft, dtype=jnp.float32)
    w = 0.5 - 0.5 * jnp.cos(2.0 * jnp.pi * n / n_fft)
    k = jnp.arange(n_fft // 2 + 1, dtype=jnp.float32)
    ang = 2.0 * jnp.pi * jnp.outer(n, k) / n_fft              # (n_fft, n_bins)
    norm = 1.0 / jnp.sqrt(jnp.sum(w * w))
    wc = w[:, None] * jnp.cos(ang) * norm
    ws = -w[:, None] * jnp.sin(ang) * norm
    return wc, ws                                             # (n_fft, K) each


def _extract_frames(x, n_fft, hop):
    pad = n_fft // 2
    # F.pad(..., mode='constant') in the module, then torch.stft(center=True)
    # reflect padding inside the Spectrogram transform.
    xp = jnp.pad(x, ((0, 0), (pad, pad)), mode="constant")
    xp = jnp.pad(xp, ((0, 0), (pad, pad)), mode="reflect")
    B, L = xp.shape
    n_frames = 1 + (L - n_fft) // hop
    kept = n_frames - 2                      # module drops first & last frame
    assert kept >= 1, "signal too short for SSSLoss framing"
    if hop == n_fft:
        # overlap == 0: kept frames are contiguous and disjoint -> pure reshape.
        frames = xp[:, hop:hop * (kept + 1)].reshape(B, kept, n_fft)
    else:
        # TODO(synk): replace this gather with in-kernel strided DMA extraction.
        starts = (jnp.arange(kept) + 1) * hop
        idx = starts[:, None] + jnp.arange(n_fft)[None, :]
        frames = xp[:, idx]
    return frames.astype(jnp.float32)


def _sss_kernel(ft_ref, fp_ref, wt_ref, wp_ref, out_ref, *, TF, eps):
    # ft_ref / fp_ref: (1, TF, 128)  true / pred frames (contraction padded to 128)
    # wt_ref / wp_ref: (128, 256)    [cos | sin] DFT matrices; pred lane-shifted by 64
    # out_ref        : (1, 1, 24, 128) f32 resident accumulators
    t = pl.program_id(2)

    @pl.when(t == 0)
    def _init():
        out_ref[...] = jnp.zeros_like(out_ref)

    # Two MXU dots against the resident 256-lane RHS.  Because the pred weights
    # occupy lane columns 64:120 (and the true weights 0:56), yt + yp yields
    # Re in lanes 0:128 (true bins 0:64 | pred bins 64:128) and Im in 128:256.
    yt = jnp.dot(ft_ref[0], wt_ref[...], preferred_element_type=jnp.float32)
    yp = jnp.dot(fp_ref[0], wp_ref[...], preferred_element_type=jnp.float32)
    y = yt + yp                                   # (TF, 256)
    re = y[:, :128]                               # tile-aligned lane slices (free)
    im = y[:, 128:]
    s = jnp.sqrt(re * re + im * im) + eps         # (TF, 128): S_true | S_pred

    # Padded bins/frames have exactly zero Re/Im -> s == eps in BOTH halves, so
    # diff and |log ratio| vanish exactly on padding; no masks needed.
    s_sw = pltpu.roll(s, shift=64, axis=1)        # swap true/pred halves (XLU)
    diff = s - s_sw
    summ = s + s_sw
    logs = jnp.log(s)
    logd = jnp.abs(logs - pltpu.roll(logs, shift=64, axis=1))

    g = TF // 8

    def gsum(x):                                  # (TF,128) -> (8,128) vreg adds
        return jnp.sum(x.reshape(g, 8, 128), axis=0)

    # Aligned full-vreg accumulator updates (no masked sub-sublane stores).
    out_ref[0, 0, 0:8, :] += gsum(diff * diff)
    out_ref[0, 0, 8:16, :] += gsum(summ * summ)
    out_ref[0, 0, 16:24, :] += gsum(logd)


def sss_loss(x_true, x_pred, n_fft=111, alpha=1.0, overlap=0.0, eps=1e-7,
             matmul_dtype=jnp.bfloat16, max_tile_frames=1024):
    hop = int(n_fft * (1.0 - overlap))
    K = n_fft // 2 + 1
    assert K <= 64, "kernel packs true|pred bins into one 128-lane row; needs n_fft//2+1 <= 64"

    ft = _extract_frames(x_true, n_fft, hop)       # (B, Fk, n_fft) f32
    fp = _extract_frames(x_pred, n_fft, hop)
    B, Fk, N = ft.shape
    assert N <= 128

    # v7x megacore: with a single batch, split the frame axis over 2 "parallel"
    # partitions (each with its own accumulator slot) so both TCs get work.
    P = 2 if (B == 1 and Fk >= 16) else 1
    fpart = _cdiv(Fk, P)                           # frames per partition
    TF = min(_round_up(fpart, 8), max_tile_frames) # large frame tile (mult of 8)
    n_tiles = _cdiv(fpart, TF)
    Fk_pad = P * n_tiles * TF

    def pack(fr):
        fr = jnp.pad(fr, ((0, 0), (0, Fk_pad - Fk), (0, 128 - N)))
        return fr.astype(matmul_dtype)             # (B, Fk_pad, 128)

    ft_p = pack(ft)
    fp_p = pack(fp)

    # RHS: 256-lane [cos | sin].  True weights in lanes 0:K / 128:128+K, pred
    # weights lane-shifted to 64:64+K / 192:192+K; everything else exactly zero.
    wc, ws = _dft_matrices(n_fft)
    Wt = (jnp.zeros((128, 256), jnp.float32)
          .at[:N, 0:K].set(wc).at[:N, 128:128 + K].set(ws)).astype(matmul_dtype)
    Wp = (jnp.zeros((128, 256), jnp.float32)
          .at[:N, 64:64 + K].set(wc).at[:N, 192:192 + K].set(ws)).astype(matmul_dtype)

    kernel = functools.partial(_sss_kernel, TF=TF, eps=eps)

    rows = B * Fk_pad
    cost = pl.CostEstimate(
        flops=2 * 2 * rows * 128 * 256,
        transcendentals=2 * rows * 128,
        bytes_accessed=int(ft_p.size * ft_p.dtype.itemsize * 2
                           + Wt.size * Wt.dtype.itemsize * 2
                           + B * P * 24 * 128 * 4),
    )

    partials = pl.pallas_call(
        kernel,
        out_shape=jax.ShapeDtypeStruct((B, P, 24, 128), jnp.float32),
        grid_spec=pltpu.PrefetchScalarGridSpec(
            num_scalar_prefetch=0,
            grid=(B, P, n_tiles),
            in_specs=[
                pl.BlockSpec((1, TF, 128), lambda b, p, t: (b, p * n_tiles + t, 0)),
                pl.BlockSpec((1, TF, 128), lambda b, p, t: (b, p * n_tiles + t, 0)),
                pl.BlockSpec((128, 256), lambda b, p, t: (0, 0)),   # resident
                pl.BlockSpec((128, 256), lambda b, p, t: (0, 0)),   # resident
            ],
            out_specs=pl.BlockSpec((1, 1, 24, 128), lambda b, p, t: (b, p, 0, 0)),
        ),
        compiler_params=pltpu.CompilerParams(
            dimension_semantics=("parallel", "parallel", "arbitrary"),
            vmem_limit_bytes=32 * 1024 * 1024,
        ),
        cost_estimate=cost,
    )(ft_p, fp_p, Wt, Wp)

    # Tiny epilogue in plain JAX: undo the mirrored lane halves (0.5), reduce
    # partitions/sublanes/lanes, finalize per-batch ratio and the global means.
    part = partials.reshape(B, P, 3, 8, 128)
    sums = 0.5 * jnp.sum(part, axis=(1, 3, 4))          # (B, 3)
    d2, s2, lsum = sums[:, 0], sums[:, 1], sums[:, 2]
    converge = jnp.mean(jnp.sqrt(d2 / s2))
    log_term = jnp.sum(lsum) / (B * Fk * K)
    return converge + alpha * log_term


def _sss_loss_ref(x_true, x_pred, n_fft=111, alpha=1.0, overlap=0.0, eps=1e-7):
    # Pure-JAX reference of the same math, used to sanity-check the kernel.
    hop = int(n_fft * (1.0 - overlap))
    wc, ws = _dft_matrices(n_fft)
    ft = _extract_frames(x_true, n_fft, hop)
    fp = _extract_frames(x_pred, n_fft, hop)

    def mag(f):
        re = jnp.einsum("bfn,nk->bfk", f, wc)
        im = jnp.einsum("bfn,nk->bfk", f, ws)
        return jnp.sqrt(re * re + im * im) + eps

    S_t, S_p = mag(ft), mag(fp)
    d = jnp.sqrt(jnp.sum((S_t - S_p) ** 2, axis=(1, 2)))
    s = jnp.sqrt(jnp.sum((S_t + S_p) ** 2, axis=(1, 2)))
    converge = jnp.mean(d / s)
    log_term = jnp.mean(jnp.abs(jnp.log(S_t) - jnp.log(S_p)))
    return converge + alpha * log_term


if __name__ == "__main__":
    key = jax.random.PRNGKey(0)
    k1, k2 = jax.random.split(key)

    # Small case: 2 signals, 444 samples -> 5 STFT frames, 3 kept.
    B, T = 2, 444
    x_true = jax.random.normal(k1, (B, T), dtype=jnp.float32)
    x_pred = x_true + 0.1 * jax.random.normal(k2, (B, T), dtype=jnp.float32)

    ref = jax.block_until_ready(_sss_loss_ref(x_true, x_pred))

    # Default fast path: bf16 MXU operands, f32 accumulation / elementwise.
    loss_bf16 = jax.block_until_ready(sss_loss(x_true, x_pred))
    assert jnp.isfinite(loss_bf16), "bf16-path loss is not finite"
    assert jnp.allclose(loss_bf16, ref, rtol=5e-2, atol=1e-3), (loss_bf16, ref)

    # Strict path: f32 MXU operands.
    loss_f32 = jax.block_until_ready(sss_loss(x_true, x_pred, matmul_dtype=jnp.float32))
    assert jnp.isfinite(loss_f32), "f32-path loss is not finite"
    assert jnp.allclose(loss_f32, ref, rtol=1e-2, atol=1e-4), (loss_f32, ref)

    # B == 1 exercises the two-partition (v7x megacore) path.
    xt1 = jax.random.normal(k1, (1, 111 * 40), dtype=jnp.float32)
    xp1 = xt1 + 0.05 * jax.random.normal(k2, (1, 111 * 40), dtype=jnp.float32)
    r1 = jax.block_until_ready(_sss_loss_ref(xt1, xp1))
    l1 = jax.block_until_ready(sss_loss(xt1, xp1))
    assert jnp.isfinite(l1), "partitioned-path loss is not finite"
    assert jnp.allclose(l1, r1, rtol=5e-2, atol=1e-3), (l1, r1)

    print("KERNEL_OK")
</pallas_src>

<mosaic_0001>
module attributes {stable_mosaic.version = 11 : i64} {
  func.func @_sss_kernel(%arg0: i32, %arg1: i32, %arg2: i32, %arg3: memref<1x8x128xbf16, #tpu.memory_space<vmem>>, %arg4: memref<1x8x128xbf16, #tpu.memory_space<vmem>>, %arg5: memref<128x256xbf16, #tpu.memory_space<vmem>>, %arg6: memref<128x256xbf16, #tpu.memory_space<vmem>>, %arg7: memref<1x1x24x128xf32, #tpu.memory_space<vmem>>) attributes {dimension_semantics = [#tpu.dimension_semantics<parallel>, #tpu.dimension_semantics<parallel>, #tpu.dimension_semantics<arbitrary>], iteration_bounds = array<i64: 2, 1, 1>, scalar_prefetch = 0 : i64, scratch_operands = 0 : i64, tpu.core_type = #tpu.core_type<tc>, window_params = [{transform_indices = @transform_0, window_bounds = array<i64: 1, 8, 128>}, {transform_indices = @transform_1, window_bounds = array<i64: 1, 8, 128>}, {pipeline_mode = #tpu.pipeline_mode<synchronous>, transform_indices = @transform_2, window_bounds = array<i64: 128, 256>}, {pipeline_mode = #tpu.pipeline_mode<synchronous>, transform_indices = @transform_3, window_bounds = array<i64: 128, 256>}, {transform_indices = @transform_4, window_bounds = array<i64: 1, 1, 24, 128>}]} {
    %c0_i32 = arith.constant 0 : i32
    %0 = arith.cmpi eq, %arg2, %c0_i32 : i32
    %1 = arith.extui %0 : i1 to i32
    %c0_i32_0 = arith.constant 0 : i32
    %2 = arith.cmpi ne, %1, %c0_i32_0 : i32
    scf.if %2 {
      %cst_38 = arith.constant 0.000000e+00 : f32
      %53 = vector.broadcast %cst_38 : f32 to vector<1x1x24x128xf32>
      %c0_39 = arith.constant 0 : index
      %c0_40 = arith.constant 0 : index
      %c0_41 = arith.constant 0 : index
      %c0_42 = arith.constant 0 : index
      %54 = vector.load %arg7[%c0_39, %c0_40, %c0_41, %c0_42] : memref<1x1x24x128xf32, #tpu.memory_space<vmem>>, vector<1x1x24x128xf32>
      tpu.vector_store %arg7[%c0_39, %c0_40, %c0_41, %c0_42], %53 {strides = array<i32>} : memref<1x1x24x128xf32, #tpu.memory_space<vmem>>, vector<1x1x24x128xf32>,
    } else {
    }
    %c0 = arith.constant 0 : index
    %c0_1 = arith.constant 0 : index
    %c0_2 = arith.constant 0 : index
    %3 = vector.load %arg3[%c0, %c0_1, %c0_2] : memref<1x8x128xbf16, #tpu.memory_space<vmem>>, vector<1x8x128xbf16>
    %4 = vector.shape_cast %3 : vector<1x8x128xbf16> to vector<8x128xbf16>
    %c0_3 = arith.constant 0 : index
    %c0_4 = arith.constant 0 : index
    %5 = vector.load %arg5[%c0_3, %c0_4] : memref<128x256xbf16, #tpu.memory_space<vmem>>, vector<128x256xbf16>
    %cst = arith.constant dense<0.000000e+00> : vector<8x256xf32>
    %6 = tpu.matmul %4, %5, %cst {dimension_numbers = #tpu.dot_dimension_numbers<[1], [0], [0], [1], [0, 0, 1, 1], [], []>} : vector<8x128xbf16>, vector<128x256xbf16>, vector<8x256xf32> -> vector<8x256xf32>
    %c0_5 = arith.constant 0 : index
    %c0_6 = arith.constant 0 : index
    %c0_7 = arith.constant 0 : index
    %7 = vector.load %arg4[%c0_5, %c0_6, %c0_7] : memref<1x8x128xbf16, #tpu.memory_space<vmem>>, vector<1x8x128xbf16>
    %8 = vector.shape_cast %7 : vector<1x8x128xbf16> to vector<8x128xbf16>
    %c0_8 = arith.constant 0 : index
    %c0_9 = arith.constant 0 : index
    %9 = vector.load %arg6[%c0_8, %c0_9] : memref<128x256xbf16, #tpu.memory_space<vmem>>, vector<128x256xbf16>
    %cst_10 = arith.constant dense<0.000000e+00> : vector<8x256xf32>
    %10 = tpu.matmul %8, %9, %cst_10 {dimension_numbers = #tpu.dot_dimension_numbers<[1], [0], [0], [1], [0, 0, 1, 1], [], []>} : vector<8x128xbf16>, vector<128x256xbf16>, vector<8x256xf32> -> vector<8x256xf32>
    %11 = arith.addf %6, %10 : vector<8x256xf32>
    %12 = vector.extract_strided_slice %11 {offsets = [0, 0], sizes = [8, 128], strides = [1, 1]} : vector<8x256xf32> to vector<8x128xf32>
    %13 = vector.extract_strided_slice %11 {offsets = [0, 128], sizes = [8, 128], strides = [1, 1]} : vector<8x256xf32> to vector<8x128xf32>
    %14 = arith.mulf %12, %12 : vector<8x128xf32>
    %15 = arith.mulf %13, %13 : vector<8x128xf32>
    %16 = arith.addf %14, %15 : vector<8x128xf32>
    %17 = math.sqrt %16 : vector<8x128xf32>
    %cst_11 = arith.constant 1.000000e-07 : f32
    %18 = vector.broadcast %cst_11 : f32 to vector<8x128xf32>
    %19 = arith.addf %17, %18 : vector<8x128xf32>
    %c64_i32 = arith.constant 64 : i32
    %20 = tpu.dynamic_rotate %19 by %c64_i32 dim 1 : vector<8x128xf32>, i32 -> vector<8x128xf32>
    %21 = arith.subf %19, %20 : vector<8x128xf32>
    %22 = arith.addf %19, %20 : vector<8x128xf32>
    %23 = math.log %19 : vector<8x128xf32>
    %c64_i32_12 = arith.constant 64 : i32
    %24 = tpu.dynamic_rotate %23 by %c64_i32_12 dim 1 : vector<8x128xf32>, i32 -> vector<8x128xf32>
    %25 = arith.subf %23, %24 : vector<8x128xf32>
    %26 = math.absf %25 : vector<8x128xf32>
    %c0_13 = arith.constant 0 : index
    %c0_14 = arith.constant 0 : index
    %c0_15 = arith.constant 0 : index
    %c0_16 = arith.constant 0 : index
    %27 = vector.load %arg7[%c0_13, %c0_14, %c0_15, %c0_16] : memref<1x1x24x128xf32, #tpu.memory_space<vmem>>, vector<1x1x8x128xf32>
    %28 = vector.shape_cast %27 : vector<1x1x8x128xf32> to vector<8x128xf32>
    %29 = arith.mulf %21, %21 : vector<8x128xf32>
    %30 = vector.shape_cast %29 : vector<8x128xf32> to vector<1x8x128xf32>
    %cst_17 = arith.constant dense<0.000000e+00> : vector<8x128xf32>
    %31 = vector.multi_reduction <add>, %30, %cst_17 [0] : vector<1x8x128xf32> to vector<8x128xf32>
    %32 = arith.addf %28, %31 : vector<8x128xf32>
    %c0_18 = arith.constant 0 : index
    %c0_19 = arith.constant 0 : index
    %c0_20 = arith.constant 0 : index
    %c0_21 = arith.constant 0 : index
    %33 = vector.load %arg7[%c0_18, %c0_19, %c0_20, %c0_21] : memref<1x1x24x128xf32, #tpu.memory_space<vmem>>, vector<1x1x8x128xf32>
    %34 = vector.shape_cast %33 : vector<1x1x8x128xf32> to vector<8x128xf32>
    %35 = vector.shape_cast %32 : vector<8x128xf32> to vector<1x1x8x128xf32>
    tpu.vector_store %arg7[%c0_18, %c0_19, %c0_20, %c0_21], %35 {strides = array<i32>} : memref<1x1x24x128xf32, #tpu.memory_space<vmem>>, vector<1x1x8x128xf32>,
    %c0_22 = arith.constant 0 : index
    %c0_23 = arith.constant 0 : index
    %c8 = arith.constant 8 : index
    %c0_24 = arith.constant 0 : index
    %36 = vector.load %arg7[%c0_22, %c0_23, %c8, %c0_24] : memref<1x1x24x128xf32, #tpu.memory_space<vmem>>, vector<1x1x8x128xf32>
    %37 = vector.shape_cast %36 : vector<1x1x8x128xf32> to vector<8x128xf32>
    %38 = arith.mulf %22, %22 : vector<8x128xf32>
    %39 = vector.shape_cast %38 : vector<8x128xf32> to vector<1x8x128xf32>
    %cst_25 = arith.constant dense<0.000000e+00> : vector<8x128xf32>
    %40 = vector.multi_reduction <add>, %39, %cst_25 [0] : vector<1x8x128xf32> to vector<8x128xf32>
    %41 = arith.addf %37, %40 : vector<8x128xf32>
    %c0_26 = arith.constant 0 : index
    %c0_27 = arith.constant 0 : index
    %c8_28 = arith.constant 8 : index
    %c0_29 = arith.constant 0 : index
    %42 = vector.load %arg7[%c0_26, %c0_27, %c8_28, %c0_29] : memref<1x1x24x128xf32, #tpu.memory_space<vmem>>, vector<1x1x8x128xf32>
    %43 = vector.shape_cast %42 : vector<1x1x8x128xf32> to vector<8x128xf32>
    %44 = vector.shape_cast %41 : vector<8x128xf32> to vector<1x1x8x128xf32>
    tpu.vector_store %arg7[%c0_26, %c0_27, %c8_28, %c0_29], %44 {strides = array<i32>} : memref<1x1x24x128xf32, #tpu.memory_space<vmem>>, vector<1x1x8x128xf32>,
    %c0_30 = arith.constant 0 : index
    %c0_31 = arith.constant 0 : index
    %c16 = arith.constant 16 : index
    %c0_32 = arith.constant 0 : index
    %45 = vector.load %arg7[%c0_30, %c0_31, %c16, %c0_32] : memref<1x1x24x128xf32, #tpu.memory_space<vmem>>, vector<1x1x8x128xf32>
    %46 = vector.shape_cast %45 : vector<1x1x8x128xf32> to vector<8x128xf32>
    %47 = vector.shape_cast %26 : vector<8x128xf32> to vector<1x8x128xf32>
    %cst_33 = arith.constant dense<0.000000e+00> : vector<8x128xf32>
    %48 = vector.multi_reduction <add>, %47, %cst_33 [0] : vector<1x8x128xf32> to vector<8x128xf32>
    %49 = arith.addf %46, %48 : vector<8x128xf32>
    %c0_34 = arith.constant 0 : index
    %c0_35 = arith.constant 0 : index
    %c16_36 = arith.constant 16 : index
    %c0_37 = arith.constant 0 : index
    %50 = vector.load %arg7[%c0_34, %c0_35, %c16_36, %c0_37] : memref<1x1x24x128xf32, #tpu.memory_space<vmem>>, vector<1x1x8x128xf32>
    %51 = vector.shape_cast %50 : vector<1x1x8x128xf32> to vector<8x128xf32>
    %52 = vector.shape_cast %49 : vector<8x128xf32> to vector<1x1x8x128xf32>
    tpu.vector_store %arg7[%c0_34, %c0_35, %c16_36, %c0_37], %52 {strides = array<i32>} : memref<1x1x24x128xf32, #tpu.memory_space<vmem>>, vector<1x1x8x128xf32>,
    return
  }
  func.func @transform_0(%arg0: i32, %arg1: i32, %arg2: i32) -> (i32, i32, i32) {
    %c1_i32 = arith.constant 1 : i32
    %0 = arith.muli %arg1, %c1_i32 : i32
    %1 = arith.addi %0, %arg2 : i32
    %c0_i32 = arith.constant 0 : i32
    %c0_i32_0 = arith.constant 0 : i32
    return %arg0, %1, %c0_i32 : i32, i32, i32
  }
  func.func @transform_1(%arg0: i32, %arg1: i32, %arg2: i32) -> (i32, i32, i32) {
    %c1_i32 = arith.constant 1 : i32
    %0 = arith.muli %arg1, %c1_i32 : i32
    %1 = arith.addi %0, %arg2 : i32
    %c0_i32 = arith.constant 0 : i32
    %c0_i32_0 = arith.constant 0 : i32
    return %arg0, %1, %c0_i32 : i32, i32, i32
  }
  func.func @transform_2(%arg0: i32, %arg1: i32, %arg2: i32) -> (i32, i32) {
    %c0_i32 = arith.constant 0 : i32
    %c0_i32_0 = arith.constant 0 : i32
    %c0_i32_1 = arith.constant 0 : i32
    return %c0_i32, %c0_i32_0 : i32, i32
  }
  func.func @transform_3(%arg0: i32, %arg1: i32, %arg2: i32) -> (i32, i32) {
    %c0_i32 = arith.constant 0 : i32
    %c0_i32_0 = arith.constant 0 : i32
    %c0_i32_1 = arith.constant 0 : i32
    return %c0_i32, %c0_i32_0 : i32, i32
  }
  func.func @transform_4(%arg0: i32, %arg1: i32, %arg2: i32) -> (i32, i32, i32, i32) {
    %c0_i32 = arith.constant 0 : i32
    %c0_i32_0 = arith.constant 0 : i32
    %c0_i32_1 = arith.constant 0 : i32
    return %arg0, %arg1, %c0_i32, %c0_i32_0 : i32, i32, i32, i32
  }
}

</mosaic_0001>

<bundles_post_ra>
// kernel: tpu_custom_call.1
= control target key start
LH: loop header
LB: loop body
LE: loop exit
PB: predicated region body
PF: predicated region fallthrough
CT: control target
= control target key end

     0   :  { %s1458_s0 = inlined_call_operand.hbm [shape: bf16[2,8,128], index: 0, kind: input, shape index: {}]   ;;  %s1459_s1 = inlined_call_operand.hbm [shape: bf16[2,8,128], index: 1, kind: input, shape index: {}]   ;;  %s1460_s2 = inlined_call_operand.hbm [shape: bf16[128,256], index: 2, kind: input, shape index: {}]   ;;  %s1461_s3 = inlined_call_operand.hbm [shape: bf16[128,256], index: 3, kind: input, shape index: {}]   ;;  %s1462_s4 = inlined_call_operand.hbm [shape: f32[2,1,24,128], index: 4, kind: output, shape index: {}]  }
   0x1   :  { %1465 = sst [smem:[#allocation19_spill]] %s1460_s2 }
   0x2   :  { %1466 = sst [smem:[#allocation20_spill]] %s1461_s3 }
   0x3   :  { %9 = vsyncpa [#allocation3], 0 }
   0x4   :  { %11 = vsyncpa [#allocation3 + $0x1], 0 }
   0x5   :  { %12 = vsyncpa [#allocation6], 0 }
   0x6   :  { %14 = vsyncpa [#allocation6 + $0x1], 0 }
   0x7   :  { %15 = vsyncpa [#allocation9], 0 }
   0x8   :  { %16 = vsyncpa [#allocation4], 0 }
   0x9   :  { %18 = vsyncpa [#allocation4 + $0x1], 0  ;;  %s1292_s15 = smov 0   ;;  %s1294_s16 = smov 0  }
   0xa   :  { %s1296_s17 = smov 0   ;;  %s1298_s18 = smov 0  }
   0xb   :  { %s1300_s19 = smov 0   ;;  %s1302_s20 = smov 0  }
   0xc LB: > { %1467 = sst [smem:[#allocation16_spill]] %s1254_s19  ;;  %s1323_s21 = sadd.s32 4294967295, %s1258_s20   ;;  %s1258_s20 = sphi %s1302_s20, %s24_s20   ;;  %s1254_s19 = sphi %s1300_s19, %s1483_s19   ;;  %s1250_s18 = sphi %s1298_s18, %s1478_s18   ;;  %s1246_s17 = sphi %s1296_s17, %s1482_s17   ;;  %s1242_s16 = sphi %s1294_s16, %s1481_s16   ;;  %s1238_s15 = sphi %s1292_s15, %s1480_s15  }
   0xd   : > { %p768_p0 = scmp.ge.s32.totalorder %s1258_s20, 1  ;;  %p68_p1 = scmp.eq.s32.totalorder %s1323_s21, 0 }
   0xe   : > { %p178_p2 = scmp.lt.s32.totalorder %s1258_s20, 3  ;;  %s1468_s2 = sld [smem:[#allocation19_spill]] }
   0xf   : > { %s1260_s26 = smov [#allocation7]   ;;  %p771_p6 = scmp.ge.s32.totalorder %s1258_s20, 2 }
  0x10   : > { %p1331_p3 = pnand %p768_p0, %p178_p2  ;;  %s191_s27 = sshll.u32 %s1260_s26, 4  ;;  %s192_s27 = int_to_ptr.vmem [resolvable:$true] %s191_s27 }
  0x11   : > { %s1470_s3 = sld [smem:[#allocation20_spill]]  ;;  %s1261_s5 = smov 128  }
  0x12   : > { %p960_p4 = pneg %p1331_p3  ;;  %s1262_s6 = smov 8  }
  0x13   : > { %s1263_s7 = smov [#allocation8]   ;;  %s767_s9 = sadd.s32 4294967294, %s1258_s20  }
  0x14   : > { %s189_s24 = sshll.u32 %s1468_s2, 4  ;;  %p961_p5 = pnand %p960_p4, %p68_p1  ;;  %s190_s24 = int_to_ptr.hbm [resolvable:$true] %s189_s24 }
  0x15   : > { %s205_s8 = sshll.u32 %s1263_s7, 4  ;;  %s43_s10 = sadd.s32 1, %s1254_s19  ;;  %s206_s8 = int_to_ptr.vmem [resolvable:$true] %s205_s8 }
  0x16   : > { %963 = dma.hbm_to_vmem [thread:$0]  (!%p961_p5), %s190_s24, 2048, %s192_s27, [#allocation6], %s1261_s5, %s1261_s5, %s1262_s6  }
  0x17   : > { %s203_s30 = sshll.u32 %s1470_s3, 4  ;;  %p45_p7 = scmp.ge.s32.totalorder %s43_s10, 2  ;;  %s204_s30 = int_to_ptr.hbm [resolvable:$true] %s203_s30 }
  0x18   : > { %966 = dma.hbm_to_vmem [thread:$0]  (!%p961_p5), %s204_s30, 2048, %s206_s8, [#allocation9], %s1261_s5, %s1261_s5, %s1262_s6  }
  0x19   : > { %s54_s11 = sadd.s32 1, %s1246_s17  ;;  %p61_p8 = scmp.ne.s32.totalorder %s1246_s17, %s1242_s16 }
  0x1a   : > { %p62_p9 = scmp.eq.s32.totalorder %s1258_s20, 0  ;;  %s1485_s10 = smov (%p45_p7, %s43_s10), 0 }
  0x1b   : > { %1471 = sst [smem:[#allocation17_spill]] %s1485_s10  ;;  %p67_p11 = scmp.ne.s32.totalorder %s1242_s16, %s1238_s15 }
  0x1c   : > { %p1351_p10 = por %p62_p9, %p61_p8  ;;  %s49_s13 = ssub.s32 %s1254_s19, %s1485_s10 }
  0x1d   : > { %p165_p12 = scmp.eq.s32.totalorder %s1323_s21, 1  ;;  %p52_p13 = scmp.eq.s32.totalorder %s49_s13, 0 }
  0x1e   : > { %p1362_p0 = por %p68_p1, %p67_p11  ;;  %p171_p4 = scmp.eq.s32.totalorder %s767_s9, 1 }
  0x1f   : > { %p1366_p2 = por %p165_p12, %p61_p8  ;;  %p980_p7 = scmp.lt.s32.totalorder %s1258_s20, 2 }
  0x20   : > { %s1371_s23 = scalar_select %p52_p13, %s1246_s17, %s54_s11  }
  0x21   : > { %p1373_p5 = por %p171_p4, %p67_p11  ;;  %s219_s26 = sand.u32 1, %s1246_s17  }
  0x22   : > { %1475 = sst [smem:[#allocation18_spill]] %s1371_s23  ;;  %s773_s27 = sshll.u32 %s1254_s19, 2 }
  0x23   : > { %s772_s28 = sshll.u32 %s219_s26, 2  ;;  %s229_s5 = scalar_lea.hbm %s1458_s0, %s773_s27 }
  0x24   : > { %s231_s6 = sshll.u32 %s229_s5, 4  ;;  %s223_s7 = scalar_lea.vmem [#allocation2], %s772_s28  ;;  %s232_s6 = int_to_ptr.hbm [resolvable:$true] %s231_s6 }
  0x25   : > { %s233_s8 = sshll.u32 %s223_s7, 4  ;;  %p968_p8 = pnand %p980_p7, %p1351_p10  ;;  %s234_s8 = int_to_ptr.vmem [resolvable:$true] %s233_s8 }
  0x26   : > { %s250_s13 = scalar_lea.hbm %s1459_s1, %s773_s27  ;;  %s240_s2 = sand.u32 1, %s1258_s20  }
  0x27   : > { %s220_s3 = scalar_lea.sflag [#allocation3], %s219_s26  ;;  %s252_s10 = sshll.u32 %s250_s13, 4  ;;  %s253_s10 = int_to_ptr.hbm [resolvable:$true] %s252_s10 }
  0x28   : > { %970 = dma.hbm_to_vmem [thread:$0]  (!%p968_p8), %s232_s6, 64, %s234_s8, %s220_s3  }
  0x29   : > { %s244_s19 = scalar_lea.vmem [#allocation5], %s772_s28  ;;  %s241_s29 = scalar_lea.sflag [#allocation6], %s240_s2 }
  0x2a   : > { %s254_s23 = sshll.u32 %s244_s19, 4  ;;  %263 = sbr.rel (%p1331_p3) target bundleno = 384 (0x180), region = 36  ;;  %s255_s23 = int_to_ptr.vmem [resolvable:$true] %s254_s23 }
  0x2b   : > { %973 = dma.hbm_to_vmem [thread:$0]  (!%p968_p8), %s253_s10, 64, %s255_s23, %s241_s29  }
  0x2c   : > { %s1392_s12 = sand.u32 (!%p1331_p3), 1, %s1242_s16  }
  0x2d   : > { %s777_s27 = sshll.u32 (!%p1331_p3), %s1392_s12, 2  ;;  %s266_s30 = scalar_lea.sflag (!%p1331_p3), [#allocation3], %s1392_s12 }
  0x2e   : > { %s1396_s26 = scalar_lea.vmem (!%p1331_p3), [#allocation2], %s777_s27 }
  0x2f   : > { %1217 = dma.done.wait (%p1362_p0), %s266_s30, 64  }
  0x30   : > { %1219 = vsyncadd (%p1362_p0), %s266_s30, 4294967232  ;;  %s275_s2 = sand.u32 1, %s1323_s21   ;;  %s1403_s19 = scalar_lea.vmem [#allocation5], %s777_s27 }
  0x31   : > { %s276_s3 = scalar_lea.sflag [#allocation6], %s275_s2 }
  0x32   : > { %1221 = dma.done.wait (%p1362_p0), %s276_s3, 64  }
  0x33   : > { %1223 = vsyncadd (%p1362_p0), %s276_s3, 4294967232 }
  0x34   : > { %1225 = dma.done.wait (%p68_p1), [#allocation6], 2048  }
  0x35   : > { %1227 = vsyncadd (%p68_p1), [#allocation6], 4294965248 }
  0x36   : > { %1229 = dma.done.wait (%p68_p1), [#allocation9], 2048  }
  0x37   : > { %1231 = vsyncadd (%p68_p1), [#allocation9], 4294965248  ;;  %v839_v0 = vld [vmem:[#allocation8 + $0x70] sm:$0xf]  ;;  %v943_v1 = vld [vmem:[#allocation8 + $0x74] sm:$0xf0] }
  0x38   : > { %v942_v2 = vld [vmem:[#allocation8 + $0x74] sm:$0xf]  ;;  %v840_v3 = vor.u32 %v943_v1, %v839_v0  ;;  %v841_v4 = vld [vmem:[#allocation8 + $0x78] sm:$0xf0]  ;;  %v903_v5 = vld [vmem:[#allocation7 + $0x70] sm:$0xf] }
  0x39   : > { %v927_v6 = vld [vmem:[#allocation7 + $0x74] sm:$0xf0]  ;;  %v844_v7 = vor.u32 %v942_v2, %v841_v4  ;;  %v926_v9 = vld [vmem:[#allocation7 + $0x74] sm:$0xf]  ;;  %v905_v10 = vld [vmem:[#allocation7 + $0x78] sm:$0xf0] }
  0x3a   : > { %v904_v8 = vor.u32 %v927_v6, %v903_v5  ;;  %v831_v11 = vld [vmem:[#allocation8 + $0x60] sm:$0xf]  ;;  %443 = vmatpush.bf16.msra.mxu0 %v840_v3  ;;  %v908_v12 = vor.u32 %v926_v9, %v905_v10  ;;  %v941_v13 = vld [vmem:[#allocation8 + $0x64] sm:$0xf0]  ;;  %v940_v14 = vld [vmem:[#allocation8 + $0x64] sm:$0xf] }
  0x3b   : > { %v833_v15 = vld [vmem:[#allocation8 + $0x68] sm:$0xf0]  ;;  %456 = vmatpush.bf16.msra.mxu1 %v844_v7  ;;  %v832_v16 = vor.u32 %v941_v13, %v831_v11  ;;  %v895_v18 = vld [vmem:[#allocation7 + $0x60] sm:$0xf]  ;;  %v925_v19 = vld [vmem:[#allocation7 + $0x64] sm:$0xf0] }
  0x3c   : > { %549 = vmatpush.bf16.msra.mxu2 %v904_v8  ;;  %v836_v17 = vor.u32 %v940_v14, %v833_v15  ;;  %v924_v20 = vld [vmem:[#allocation7 + $0x64] sm:$0xf]  ;;  %562 = vmatpush.bf16.msra.mxu3 %v908_v12  ;;  %v896_v21 = vor.u32 %v925_v19, %v895_v18  ;;  %v897_v22 = vld [vmem:[#allocation7 + $0x68] sm:$0xf0]  ;;  %v823_v23 = vld [vmem:[#allocation8 + $0x50] sm:$0xf] }
  0x3d   : > { %v939_v24 = vld [vmem:[#allocation8 + $0x54] sm:$0xf0]  ;;  %v900_v25 = vor.u32 %v924_v20, %v897_v22  ;;  %v938_v26 = vld [vmem:[#allocation8 + $0x54] sm:$0xf]  ;;  %v825_v27 = vld [vmem:[#allocation8 + $0x58] sm:$0xf0] }
  0x3e   : > { %v887_v28 = vld [vmem:[#allocation7 + $0x50] sm:$0xf]  ;;  %444 = vmatpush.bf16.msra.mxu0 %v832_v16  ;;  %v824_v29 = vor.u32 %v939_v24, %v823_v23  ;;  %v923_v30 = vld [vmem:[#allocation7 + $0x54] sm:$0xf0]  ;;  %v922_v31 = vld [vmem:[#allocation7 + $0x54] sm:$0xf]  ;;  %v828_v33 = vor.u32 %v938_v26, %v825_v27 }
  0x3f   : > { %v889_v32 = vld [vmem:[#allocation7 + $0x58] sm:$0xf0]  ;;  %457 = vmatpush.bf16.msra.mxu1 %v836_v17  ;;  %v888_v34 = vor.u32 %v923_v30, %v887_v28  ;;  %v815_v35 = vld [vmem:[#allocation8 + $0x40] sm:$0xf]  ;;  %v937_v36 = vld [vmem:[#allocation8 + $0x44] sm:$0xf0] }
  0x40   : > { %550 = vmatpush.bf16.msra.mxu2 %v896_v21  ;;  %v936_v37 = vld [vmem:[#allocation8 + $0x44] sm:$0xf]  ;;  %563 = vmatpush.bf16.msra.mxu3 %v900_v25  ;;  %v892_v38 = vor.u32 %v922_v31, %v889_v32  ;;  %v817_v39 = vld [vmem:[#allocation8 + $0x48] sm:$0xf0]  ;;  %v879_v40 = vld [vmem:[#allocation7 + $0x40] sm:$0xf]  ;;  %v816_v44 = vor.u32 %v937_v36, %v815_v35 }
  0x41   : > { %v921_v41 = vld [vmem:[#allocation7 + $0x44] sm:$0xf0]  ;;  %v920_v42 = vld [vmem:[#allocation7 + $0x44] sm:$0xf]  ;;  %v881_v43 = vld [vmem:[#allocation7 + $0x48] sm:$0xf0]  ;;  %v820_v45 = vor.u32 %v936_v37, %v817_v39 }
  0x42   : > { %445 = vmatpush.bf16.msra.mxu0 %v824_v29  ;;  %v880_v46 = vor.u32 %v921_v41, %v879_v40  ;;  %v807_v47 = vld [vmem:[#allocation8 + $0x30] sm:$0xf]  ;;  %v935_v48 = vld [vmem:[#allocation8 + $0x34] sm:$0xf0]  ;;  %v934_v49 = vld [vmem:[#allocation8 + $0x34] sm:$0xf]  ;;  %v884_v50 = vor.u32 %v920_v42, %v881_v43 }
  0x43   : > { %458 = vmatpush.bf16.msra.mxu1 %v828_v33  ;;  %v809_v51 = vld [vmem:[#allocation8 + $0x38] sm:$0xf0]  ;;  %v871_v52 = vld [vmem:[#allocation7 + $0x30] sm:$0xf]  ;;  %v919_v53 = vld [vmem:[#allocation7 + $0x34] sm:$0xf0]  ;;  %v808_v56 = vor.u32 %v935_v48, %v807_v47 }
  0x44   : > { %551 = vmatpush.bf16.msra.mxu2 %v888_v34  ;;  %564 = vmatpush.bf16.msra.mxu3 %v892_v38  ;;  %v918_v54 = vld [vmem:[#allocation7 + $0x34] sm:$0xf]  ;;  %v873_v55 = vld [vmem:[#allocation7 + $0x38] sm:$0xf0]  ;;  %v812_v57 = vor.u32 %v934_v49, %v809_v51  ;;  %v872_v58 = vor.u32 %v919_v53, %v871_v52  ;;  %v799_v59 = vld [vmem:[#allocation8 + $0x20] sm:$0xf] }
  0x45   : > { %v933_v60 = vld [vmem:[#allocation8 + $0x24] sm:$0xf0]  ;;  %v932_v61 = vld [vmem:[#allocation8 + $0x24] sm:$0xf]  ;;  %v876_v62 = vor.u32 %v918_v54, %v873_v55  ;;  %v801_v63 = vld [vmem:[#allocation8 + $0x28] sm:$0xf0] }
  0x46   : > { %446 = vmatpush.bf16.msra.mxu0 %v816_v44  ;;  %v863_v0 = vld [vmem:[#allocation7 + $0x20] sm:$0xf]  ;;  %v917_v1 = vld [vmem:[#allocation7 + $0x24] sm:$0xf0]  ;;  %v916_v2 = vld [vmem:[#allocation7 + $0x24] sm:$0xf]  ;;  %v800_v4 = vor.u32 %v933_v60, %v799_v59  ;;  %v804_v5 = vor.u32 %v932_v61, %v801_v63 }
  0x47   : > { %459 = vmatpush.bf16.msra.mxu1 %v820_v45  ;;  %v865_v3 = vld [vmem:[#allocation7 + $0x28] sm:$0xf0]  ;;  %v864_v6 = vor.u32 %v917_v1, %v863_v0  ;;  %v791_v7 = vld [vmem:[#allocation8 + $0x10] sm:$0xf]  ;;  %v931_v8 = vld [vmem:[#allocation8 + $0x14] sm:$0xf0] }
  0x48   : > { %552 = vmatpush.bf16.msra.mxu2 %v880_v46  ;;  %565 = vmatpush.bf16.msra.mxu3 %v884_v50  ;;  %v930_v9 = vld [vmem:[#allocation8 + $0x14] sm:$0xf]  ;;  %v868_v10 = vor.u32 %v916_v2, %v865_v3  ;;  %v793_v11 = vld [vmem:[#allocation8 + $0x18] sm:$0xf0]  ;;  %v855_v12 = vld [vmem:[#allocation7 + $0x10] sm:$0xf]  ;;  %v792_v16 = vor.u32 %v931_v8, %v791_v7 }
  0x49   : > { %v915_v13 = vld [vmem:[#allocation7 + $0x14] sm:$0xf0]  ;;  %v914_v14 = vld [vmem:[#allocation7 + $0x14] sm:$0xf]  ;;  %v857_v15 = vld [vmem:[#allocation7 + $0x18] sm:$0xf0]  ;;  %v796_v17 = vor.u32 %v930_v9, %v793_v11 }
  0x4a   : > { %447 = vmatpush.bf16.msra.mxu0 %v808_v56  ;;  %v856_v18 = vor.u32 %v915_v13, %v855_v12  ;;  %v783_v19 = vld [vmem:[#allocation8] sm:$0xf]  ;;  %v929_v20 = vld [vmem:[#allocation8 + $0x4] sm:$0xf0]  ;;  %v928_v21 = vld [vmem:[#allocation8 + $0x4] sm:$0xf]  ;;  %v860_v22 = vor.u32 %v914_v14, %v857_v15 }
  0x4b   : > { %460 = vmatpush.bf16.msra.mxu1 %v812_v57  ;;  %v785_v23 = vld [vmem:[#allocation8 + $0x8] sm:$0xf0]  ;;  %v847_v24 = vld [vmem:[#allocation7] sm:$0xf]  ;;  %v913_v25 = vld [vmem:[#allocation7 + $0x4] sm:$0xf0]  ;;  %v784_v28 = vor.u32 %v929_v20, %v783_v19 }
  0x4c   : > { %553 = vmatpush.bf16.msra.mxu2 %v872_v58  ;;  %566 = vmatpush.bf16.msra.mxu3 %v876_v62  ;;  %v912_v26 = vld [vmem:[#allocation7 + $0x4] sm:$0xf]  ;;  %v849_v27 = vld [vmem:[#allocation7 + $0x8] sm:$0xf0]  ;;  %v788_v29 = vor.u32 %v928_v21, %v785_v23  ;;  %v848_v30 = vor.u32 %v913_v25, %v847_v24  ;;  %v346_v32 = vld [vmem:[%s1403_s19] sm:$0xf] }
  0x4d   : > { %v852_v31 = vor.u32 %v912_v26, %v849_v27  ;;  %v329_v33 = vld [vmem:[%s1396_s26] sm:$0xf]  ;;  %s1264_s21 = smov 64   ;;  %s944_s25 = smul.u32 24, %s1392_s12 }
  0x4e   : > { %448 = vmatpush.bf16.msra.mxu0 %v800_v4  ;;  %s945_s10 = smul.u32 24, %s1250_s18  ;;  %s616_s8 = scalar_lea.sflag [#allocation4], %s1392_s12 }
  0x4f   : > { %461 = vmatpush.bf16.msra.mxu1 %v804_v5  ;;  %s319_s14 = scalar_lea.vmem [#allocation10], %s944_s25  ;;  %s1184_s29 = scalar_lea.hbm %s1462_s4, 48 }
  0x50   : > { %554 = vmatpush.bf16.msra.mxu2 %v864_v6  ;;  %567 = vmatpush.bf16.msra.mxu3 %v868_v10  ;;  %s629_s5 = scalar_lea.hbm %s1462_s4, %s945_s10  ;;  %s630_s6 = sshll.u32 %s319_s14, 4  ;;  %s631_s6 = int_to_ptr.vmem [resolvable:$true] %s630_s6 }
  0x51   : > { %s632_s7 = sshll.u32 %s629_s5, 4  ;;  %s633_s7 = int_to_ptr.hbm [resolvable:$true] %s632_s7 }
  0x52   : > { %449 = vmatpush.bf16.msra.mxu0 %v792_v16  ;;  %s1178_s9 = sshra.s32 %s633_s7, 4  ;;  %s1179_s9 = int_to_ptr.hbm [resolvable:$true] %s1178_s9 }
  0x53   : > { %462 = vmatpush.bf16.msra.mxu1 %v796_v17  ;;  %s1180_s18 = scalar_lea.hbm %s1179_s9, 24  ;;  %p1185_p10 = scmp.lt.s32.totalorder %s1179_s9, %s1462_s4 }
  0x54   : > { %555 = vmatpush.bf16.msra.mxu2 %v856_v18  ;;  %568 = vmatpush.bf16.msra.mxu3 %v860_v22  ;;  %p1181_p1 = scmp.ne.s32.totalorder %s1179_s9, %s1180_s18  ;;  %p1186_p11 = scmp.lt.s32.totalorder %s1184_s29, %s1180_s18 }
  0x56   : > { %450 = vmatpush.bf16.msra.mxu0 %v784_v28  ;;  %p1182_p3 = pnand %p1181_p1, %p1366_p2  ;;  %p1187_p12 = por %p1186_p11, %p1185_p10 }
  0x57   : > { %463 = vmatpush.bf16.msra.mxu1 %v788_v29 }
  0x58   : > { %556 = vmatpush.bf16.msra.mxu2 %v848_v30  ;;  %569 = vmatpush.bf16.msra.mxu3 %v852_v31  ;;  %p1183_p9 = pneg %p1182_p3 }
  0x59   : > { %451 = vmatmul.bf16.vlgmr.msra.gmra.mxu0 %v346_v32 }
  0x5a   : > { %464 = vmatmul.bf16.vlgmr.msra.gmra.mxu1 %v346_v32  ;;  %p1188_p13 = pnand %p1187_p12, %p1183_p9 }
  0x5b   : > { %557 = vmatmul.bf16.vlgmr.msra.gmra.mxu2 %v329_v33  ;;  %570 = vmatmul.bf16.vlgmr.msra.gmra.mxu3 %v329_v33 }
  0xd6   : > { %v452_v34 = vpop.f32.mrf.mxu0 }
  0xd7   : > { %v465_v35 = vpop.f32.mrf.mxu1 }
  0xde   : > { %v558_v36 = vpop.f32.mrf.mxu2  ;;  %v571_v38 = vpop.f32.mrf.mxu3 }
  0xdf   : > { %v559_v37 = vadd.f32 %v558_v36, %v452_v34  ;;  %v454_v39 = vpop.f32.mrf.mxu0  ;;  %v572_v40 = vadd.f32 %v571_v38, %v465_v35  ;;  %v467_v41 = vpop.f32.mrf.mxu1 }
  0xe1   : > { %v575_v42 = vmul.f32 %v559_v37, %v559_v37  ;;  %v576_v43 = vmul.f32 %v572_v40, %v572_v40 }
  0xe3   : > { %v577_v44 = vadd.f32 %v576_v43, %v575_v42 }
  0xe5   : > { %1040 = vrsqrt.f32 %v577_v44  ;;  %vm585_vm0 = vcmp.eq.f32.partialorder %v577_v44, inf  ;;  %v588_v54 = vand.u32 2147483648, %v577_v44  ;;  %vm587_vm1 = vcmp.eq.f32.partialorder %v577_v44, 0.0 }
  0xe6   : > { %v560_v45 = vpop.f32.mrf.mxu2  ;;  %v573_v46 = vpop.f32.mrf.mxu3 }
  0xeb   : > { %v1041_v47 = vpop.eup %1040 }
  0xec   : > { %v579_v48 = vmul.f32 %v1041_v47, %v577_v44 }
  0xee   : > { %v580_v49 = vmul.f32 %v1041_v47, %v579_v48 }
  0xf0   : > { %v581_v50 = vmul.f32 0.5, %v580_v49 }
  0xf2   : > { %v582_v51 = vsub.f32 1.5, %v581_v50 }
  0xf4   : > { %v583_v52 = vmul.f32 %v1041_v47, %v582_v51 }
  0xf6   : > { %v584_v53 = vmul.f32 %v583_v52, %v577_v44 }
  0xf8   : > { %v586_v55 = vsel %vm585_vm0, %v577_v44, %v584_v53 }
  0xf9   : > { %v589_v56 = vsel %vm587_vm1, %v588_v54, %v586_v55 }
  0xfa   : > { %v590_v57 = vadd.f32 1e-07, %v589_v56 }
  0xfc   : > { %591 = vrot.lane.b32.xlu0 %v590_v57, %s1264_s21  ;;  %1042 = vlog2.f32 %v590_v57 }
 0x102   : > { %v1043_v58 = vpop.eup %1042 }
 0x103   : > { %v596_v59 = vmul.f32 0.6931472, %v1043_v58 }
 0x105   : > { %597 = vrot.lane.b32.xlu0 %v596_v59, %s1264_s21 }
 0x16e   : > { %v592_v60 = vpop.permute.xlu0 %591 }
 0x16f   : > { %v593_v61 = vsub.f32 %v590_v57, %v592_v60  ;;  %v594_v62 = vadd.f32 %v592_v60, %v590_v57 }
 0x171   : > { %v602_v63 = vmul.f32 %v593_v61, %v593_v61  ;;  %v607_v0 = vmul.f32 %v594_v62, %v594_v62 }
 0x173   : > { %605 = vst [vmem:[%s319_s14] sm:$0xff] %v602_v63 }
 0x174   : > { %610 = vst [vmem:[%s319_s14 + $0x8] sm:$0xff] %v607_v0 }
 0x177   : > { %v598_v1 = vpop.permute.xlu0 %597 }
 0x178   : > { %v599_v2 = vsub.f32 %v596_v59, %v598_v1 }
 0x17a   : > { %v600_v3 = vand.u32 2147483647, %v599_v2 }
 0x17c   : > { %614 = vst [vmem:[%s319_s14 + $0x10] sm:$0xff] %v600_v3 }
 0x17d   : > { %1191 = shalt.err (!%p1188_p13)
}
 0x17e   : > { %s1265_s12 = smov 128   ;;  %s1266_s26 = smov 8  }
 0x17f   : > { %958 = dma.vmem_to_hbm [thread:$0]  (%p1366_p2), %s631_s6, 384, %s633_s7, %s616_s8, %s1265_s12, %s1265_s12, %s1266_s26  }
 0x180 PF: > { %s647_s2 = sand.u32 1, %s1238_s15   ;;  %p975_p0 = pnand %p771_p6, %p1373_p5 }
 0x181   : > { %s648_s3 = scalar_lea.sflag [#allocation4], %s647_s2 }
 0x182   : > { %p976_p4 = pneg %p975_p0 }
 0x184   : > { %1233 = dma.done.wait (%p976_p4), %s648_s3, 384  }
 0x185   : > { %1235 = vsyncadd (%p976_p4), %s648_s3, 4294966912  ;;  %s24_s20 = sadd.s32 1, %s1258_s20   ;;  %s1477_s19 = sld [smem:[#allocation18_spill]] }
 0x186   : > { %p21_p7 = scmp.ge.s32.totalorder %s24_s20, 4   ;;  %s1478_s18 = sld [smem:[#allocation16_spill]] }
 0x187   : > { %s1479_s22 = sld [smem:[#allocation17_spill]]  ;;  %s1480_s15 = smov %s1242_s16 }
 0x188   : > { %s1481_s16 = smov %s1246_s17 }
 0x189   :  { %23 = sbr.rel (!%p21_p7) target bundleno = 12 (0xc), region = 106 }
 0x18b   : > { %s1482_s17 = smov %s1477_s19 }
 0x18d   : > { %s1483_s19 = smov %s1479_s22 }
 0x18e   :  { %654 = vsyncpa [#allocation3], 1 }
 0x18f   :  { %656 = vsyncpa [#allocation3 + $0x1], 1 }
 0x190   :  { %657 = vsyncpa [#allocation6], 1 }
 0x191   :  { %659 = vsyncpa [#allocation6 + $0x1], 1 }
 0x192   :  { %660 = vsyncpa [#allocation9], 1 }
 0x193   :  { %661 = vsyncpa [#allocation4], 1 }
 0x194   :  { %663 = vsyncpa [#allocation4 + $0x1], 1 }

</bundles_post_ra>
